<compile_context>
chip_gen: v7x
topology: tpu7x:2x2x1
jax: 0.10.0
libtpu: 0.0.40
codegen_flags: <defaults>
</compile_context>

<pallas_src>
import functools

import jax
import jax.numpy as jnp
from jax import lax
from jax.experimental import pallas as pl
from jax.experimental.pallas import tpu as pltpu


def generate_gaussian_1d(std, kernel_size):
    """1-D normalized Gaussian row: outer(w, w) == the module's 2-D filter.

    Matches GaussianLayer._generate_grid/_generate_gaussian:
      K2[i,j] = exp(-(r_i^2 + r_j^2)/(2 std^2)) / sum_{C,K,K} * C
              = (e_i / S) * (e_j / S)  with  e = exp(-r^2/(2 std^2)), S = sum(e)
    """
    lo = -kernel_size // 2 + 1          # python floor-div, same as the torch code
    hi = kernel_size // 2 + 1
    r = jnp.arange(lo, hi, dtype=jnp.float32)
    e = jnp.exp(-(r ** 2) / (2.0 * std ** 2))
    return e / jnp.sum(e)               # (K,)


def _gauss_kernel(x_ref, w_ref, o_ref, xpad_ref, *, K, H, W, TH):
    # x_ref:    (BT, H, W)   VMEM  unpadded input planes for this block
    # w_ref:    (K,)         SMEM  shared 1-D Gaussian weights
    # o_ref:    (BT, H, W)   VMEM  output planes
    # xpad_ref: (BT, Hp, Wp) VMEM  f32 scratch holding reflect-padded planes
    p = K // 2
    Hp, Wp = H + 2 * p, W + 2 * p

    # ---- stage 0: build the reflect-padded block in VMEM (in-kernel pad) ----
    # Single upcast to f32; every scratch element is written exactly once.
    xpad_ref[:, p:p + H, p:p + W] = x_ref[...].astype(jnp.float32)
    # Reflected rows (no edge repeat, == nn.ReflectionPad2d / jnp.pad 'reflect').
    for r in range(p):
        xpad_ref[:, r:r + 1, p:p + W] = \
            x_ref[:, p - r:p - r + 1, :].astype(jnp.float32)
        xpad_ref[:, p + H + r:p + H + r + 1, p:p + W] = \
            x_ref[:, H - 2 - r:H - 1 - r, :].astype(jnp.float32)
    # Reflected columns over the full padded height (corners fall out because
    # 2-D reflect padding is separable: pad rows first, then columns).
    for c in range(p):
        xpad_ref[:, :, c:c + 1] = xpad_ref[:, :, 2 * p - c:2 * p - c + 1]
        xpad_ref[:, :, p + W + c:p + W + c + 1] = \
            xpad_ref[:, :, p + W - 2 - c:p + W - 1 - c]

    # ---- stages 1+2: fused separable conv over bounded row strips ----
    n_strips = pl.cdiv(H, TH)
    aligned = (H % TH == 0) and (TH % 8 == 0)

    def strip_body(s, carry):
        # Last strip may overlap the previous one (pure recompute of identical
        # values) so every store is a full TH-row strip for any H.
        y0 = jnp.minimum(s * TH, H - TH)
        if aligned:
            y0 = pl.multiple_of(y0, 8)
        # Vertical pass: K sublane taps streamed from the padded scratch into
        # a value accumulator (no tmp plane in VMEM).
        acc = w_ref[0] * xpad_ref[:, pl.ds(y0, TH), :]
        for dy in range(1, K):
            acc = acc + w_ref[dy] * xpad_ref[:, pl.ds(y0 + dy, TH), :]
        # Horizontal pass: K lane taps on the value; output stored exactly once.
        out = w_ref[0] * acc[:, :, 0:W]
        for dx in range(1, K):
            out = out + w_ref[dx] * acc[:, :, dx:dx + W]
        o_ref[:, pl.ds(y0, TH), :] = out.astype(o_ref.dtype)
        return carry

    lax.fori_loop(0, n_strips, strip_body, 0, unroll=(n_strips <= 8))


def _pick_block_planes(B, H, W, p, budget_bytes=10 * 1024 * 1024, min_grid_steps=2):
    """Planes per grid step.

    Keeps double-buffered in/out blocks + the padded scratch under the budget
    and, when possible, produces at least `min_grid_steps` grid steps so the
    'parallel' plane axis can be sharded across both v7x TensorCores.
    """
    Hp, Wp = H + 2 * p, W + 2 * p
    per_plane = 4 * (2 * H * W + 2 * H * W + Hp * Wp)   # f32 bytes per plane in VMEM
    bt = max(1, budget_bytes // per_plane)
    if B >= min_grid_steps:
        bt = min(bt, pl.cdiv(B, min_grid_steps))
    bt = max(1, min(bt, B))
    return bt, pl.cdiv(B, bt)


def _pick_strip_rows(BT, Wp, H, vreg_budget_bytes=64 * 1024):
    """Rows per strip so the live f32 accumulator stays within ~64 KiB of vregs."""
    th = vreg_budget_bytes // (BT * Wp * 4)
    th = max(8, (th // 8) * 8)
    return min(th, H)


def gaussian_layer_forward(x, std, kernel_size):
    """x: (N, C, H, W).  Returns (N, C, H, W) (stride=[1,1], odd K)."""
    N, C, H, W = x.shape
    K = kernel_size
    assert K % 2 == 1, "GaussianLayer Pallas kernel assumes odd kernel_size"
    p = K // 2
    # Same validity constraint as nn.ReflectionPad2d / F.pad(..., 'reflect').
    assert p < H and p < W, "reflect padding requires kernel_size//2 < H and < W"

    w1 = generate_gaussian_1d(std, K)                    # (K,) -> SMEM
    B = N * C                                            # all channels share the filter
    xb = x.reshape(B, H, W)

    BT, nb = _pick_block_planes(B, H, W, p)
    Bp = BT * nb
    if Bp != B:                                          # pad plane axis (cdiv grid, no BT shrink)
        xb = jnp.pad(xb, ((0, Bp - B), (0, 0), (0, 0)))

    Hp, Wp = H + 2 * p, W + 2 * p
    TH = _pick_strip_rows(BT, Wp, H)
    kernel = functools.partial(_gauss_kernel, K=K, H=H, W=W, TH=TH)

    out = pl.pallas_call(
        kernel,
        out_shape=jax.ShapeDtypeStruct((Bp, H, W), x.dtype),
        grid_spec=pltpu.PrefetchScalarGridSpec(
            num_scalar_prefetch=0,
            grid=(nb,),
            in_specs=[
                pl.BlockSpec((BT, H, W), lambda b: (b, 0, 0)),
                pl.BlockSpec(memory_space=pltpu.MemorySpace.SMEM),
            ],
            out_specs=pl.BlockSpec((BT, H, W), lambda b: (b, 0, 0)),
            scratch_shapes=[pltpu.VMEM((BT, Hp, Wp), jnp.float32)],
        ),
        compiler_params=pltpu.CompilerParams(
            dimension_semantics=("parallel",),
            vmem_limit_bytes=32 * 1024 * 1024,
        ),
    )(xb, w1)

    if Bp != B:
        out = out[:B]
    return out.reshape(N, C, H, W)


# ----------------------------------------------------------------------------
# Pure-JAX reference: exact mirror of the PyTorch module's (non-separable) math
# ----------------------------------------------------------------------------
def _generate_gaussian_2d(std, kernel_size, channels):
    lo = -kernel_size // 2 + 1
    hi = kernel_size // 2 + 1
    r = jnp.arange(lo, hi, dtype=jnp.float32)
    xv, yv = jnp.meshgrid(r, r, indexing="ij")          # torch default 'ij'
    xy_sq = (xv ** 2 + yv ** 2) / 2.0
    xy_sq = jnp.broadcast_to(xy_sq, (channels,) + xy_sq.shape)
    k = jnp.exp(-xy_sq / (std ** 2))
    k = k / jnp.sum(k) * channels                        # normalize over C*K*K
    return k                                             # (C, K, K)


def _reference_forward(x, std, kernel_size):
    N, C, H, W = x.shape
    K = kernel_size
    p = K // 2
    w = _generate_gaussian_2d(std, K, C)
    x_pad = jnp.pad(x, ((0, 0), (0, 0), (p, p), (p, p)), mode="reflect")
    out = jnp.zeros((N, C, H, W), jnp.float32)
    for dy in range(K):
        for dx in range(K):
            out = out + w[:, dy, dx][None, :, None, None] * \
                x_pad[:, :, dy:dy + H, dx:dx + W]
    return out.astype(x.dtype)


if __name__ == "__main__":
    # GaussianLayer(input_channels=4, kernel_size=5, std=1.0)
    N, C, H, W = 2, 4, 16, 16
    K = 5
    std = jnp.float32(1.0)

    key = jax.random.PRNGKey(0)
    x = jax.random.normal(key, (N, C, H, W), dtype=jnp.float32)

    out = gaussian_layer_forward(x, std, K)
    out = jax.block_until_ready(out)

    ref = _reference_forward(x, std, K)
    assert out.shape == (N, C, H, W)
    assert jnp.allclose(out, ref, atol=1e-4, rtol=1e-4)

    print("KERNEL_OK")
</pallas_src>

<mosaic_0001>
module attributes {stable_mosaic.version = 11 : i64} {
  func.func @_gauss_kernel(%arg0: i32, %arg1: memref<4x16x16xf32, #tpu.memory_space<vmem>>, %arg2: memref<5xf32, #tpu.memory_space<smem>>, %arg3: memref<4x16x16xf32, #tpu.memory_space<vmem>>, %arg4: memref<4x20x20xf32, #tpu.memory_space<vmem>>) attributes {dimension_semantics = [#tpu.dimension_semantics<parallel>], iteration_bounds = array<i64: 2>, scalar_prefetch = 0 : i64, scratch_operands = 1 : i64, tpu.core_type = #tpu.core_type<tc>, window_params = [{transform_indices = @transform_0, window_bounds = array<i64: 4, 16, 16>}, {transform_indices = @transform_1, window_bounds = array<i64: 5>}, {transform_indices = @transform_2, window_bounds = array<i64: 4, 16, 16>}]} {
    %c0 = arith.constant 0 : index
    %c0_0 = arith.constant 0 : index
    %c0_1 = arith.constant 0 : index
    %0 = vector.load %arg1[%c0, %c0_0, %c0_1] : memref<4x16x16xf32, #tpu.memory_space<vmem>>, vector<4x16x16xf32>
    %c0_2 = arith.constant 0 : index
    %c2 = arith.constant 2 : index
    %c2_3 = arith.constant 2 : index
    %1 = vector.load %arg4[%c0_2, %c2, %c2_3] : memref<4x20x20xf32, #tpu.memory_space<vmem>>, vector<4x16x16xf32>
    tpu.vector_store %arg4[%c0_2, %c2, %c2_3], %0 {strides = array<i32>} : memref<4x20x20xf32, #tpu.memory_space<vmem>>, vector<4x16x16xf32>,
    %c0_4 = arith.constant 0 : index
    %c2_5 = arith.constant 2 : index
    %c0_6 = arith.constant 0 : index
    %2 = vector.load %arg1[%c0_4, %c2_5, %c0_6] : memref<4x16x16xf32, #tpu.memory_space<vmem>>, vector<4x1x16xf32>
    %c0_7 = arith.constant 0 : index
    %c0_8 = arith.constant 0 : index
    %c2_9 = arith.constant 2 : index
    %3 = vector.load %arg4[%c0_7, %c0_8, %c2_9] : memref<4x20x20xf32, #tpu.memory_space<vmem>>, vector<4x1x16xf32>
    tpu.vector_store %arg4[%c0_7, %c0_8, %c2_9], %2 {strides = array<i32>} : memref<4x20x20xf32, #tpu.memory_space<vmem>>, vector<4x1x16xf32>,
    %c0_10 = arith.constant 0 : index
    %c14 = arith.constant 14 : index
    %c0_11 = arith.constant 0 : index
    %4 = vector.load %arg1[%c0_10, %c14, %c0_11] : memref<4x16x16xf32, #tpu.memory_space<vmem>>, vector<4x1x16xf32>
    %c0_12 = arith.constant 0 : index
    %c18 = arith.constant 18 : index
    %c2_13 = arith.constant 2 : index
    %5 = vector.load %arg4[%c0_12, %c18, %c2_13] : memref<4x20x20xf32, #tpu.memory_space<vmem>>, vector<4x1x16xf32>
    tpu.vector_store %arg4[%c0_12, %c18, %c2_13], %4 {strides = array<i32>} : memref<4x20x20xf32, #tpu.memory_space<vmem>>, vector<4x1x16xf32>,
    %c0_14 = arith.constant 0 : index
    %c1 = arith.constant 1 : index
    %c0_15 = arith.constant 0 : index
    %6 = vector.load %arg1[%c0_14, %c1, %c0_15] : memref<4x16x16xf32, #tpu.memory_space<vmem>>, vector<4x1x16xf32>
    %c0_16 = arith.constant 0 : index
    %c1_17 = arith.constant 1 : index
    %c2_18 = arith.constant 2 : index
    %7 = vector.load %arg4[%c0_16, %c1_17, %c2_18] : memref<4x20x20xf32, #tpu.memory_space<vmem>>, vector<4x1x16xf32>
    tpu.vector_store %arg4[%c0_16, %c1_17, %c2_18], %6 {strides = array<i32>} : memref<4x20x20xf32, #tpu.memory_space<vmem>>, vector<4x1x16xf32>,
    %c0_19 = arith.constant 0 : index
    %c13 = arith.constant 13 : index
    %c0_20 = arith.constant 0 : index
    %8 = vector.load %arg1[%c0_19, %c13, %c0_20] : memref<4x16x16xf32, #tpu.memory_space<vmem>>, vector<4x1x16xf32>
    %c0_21 = arith.constant 0 : index
    %c19 = arith.constant 19 : index
    %c2_22 = arith.constant 2 : index
    %9 = vector.load %arg4[%c0_21, %c19, %c2_22] : memref<4x20x20xf32, #tpu.memory_space<vmem>>, vector<4x1x16xf32>
    tpu.vector_store %arg4[%c0_21, %c19, %c2_22], %8 {strides = array<i32>} : memref<4x20x20xf32, #tpu.memory_space<vmem>>, vector<4x1x16xf32>,
    %c0_23 = arith.constant 0 : index
    %c0_24 = arith.constant 0 : index
    %c4 = arith.constant 4 : index
    %10 = vector.load %arg4[%c0_23, %c0_24, %c4] : memref<4x20x20xf32, #tpu.memory_space<vmem>>, vector<4x20x1xf32>
    %c0_25 = arith.constant 0 : index
    %c0_26 = arith.constant 0 : index
    %c0_27 = arith.constant 0 : index
    %11 = vector.load %arg4[%c0_25, %c0_26, %c0_27] : memref<4x20x20xf32, #tpu.memory_space<vmem>>, vector<4x20x1xf32>
    tpu.vector_store %arg4[%c0_25, %c0_26, %c0_27], %10 {strides = array<i32>} : memref<4x20x20xf32, #tpu.memory_space<vmem>>, vector<4x20x1xf32>,
    %c0_28 = arith.constant 0 : index
    %c0_29 = arith.constant 0 : index
    %c16 = arith.constant 16 : index
    %12 = vector.load %arg4[%c0_28, %c0_29, %c16] : memref<4x20x20xf32, #tpu.memory_space<vmem>>, vector<4x20x1xf32>
    %c0_30 = arith.constant 0 : index
    %c0_31 = arith.constant 0 : index
    %c18_32 = arith.constant 18 : index
    %13 = vector.load %arg4[%c0_30, %c0_31, %c18_32] : memref<4x20x20xf32, #tpu.memory_space<vmem>>, vector<4x20x1xf32>
    tpu.vector_store %arg4[%c0_30, %c0_31, %c18_32], %12 {strides = array<i32>} : memref<4x20x20xf32, #tpu.memory_space<vmem>>, vector<4x20x1xf32>,
    %c0_33 = arith.constant 0 : index
    %c0_34 = arith.constant 0 : index
    %c3 = arith.constant 3 : index
    %14 = vector.load %arg4[%c0_33, %c0_34, %c3] : memref<4x20x20xf32, #tpu.memory_space<vmem>>, vector<4x20x1xf32>
    %c0_35 = arith.constant 0 : index
    %c0_36 = arith.constant 0 : index
    %c1_37 = arith.constant 1 : index
    %15 = vector.load %arg4[%c0_35, %c0_36, %c1_37] : memref<4x20x20xf32, #tpu.memory_space<vmem>>, vector<4x20x1xf32>
    tpu.vector_store %arg4[%c0_35, %c0_36, %c1_37], %14 {strides = array<i32>} : memref<4x20x20xf32, #tpu.memory_space<vmem>>, vector<4x20x1xf32>,
    %c0_38 = arith.constant 0 : index
    %c0_39 = arith.constant 0 : index
    %c15 = arith.constant 15 : index
    %16 = vector.load %arg4[%c0_38, %c0_39, %c15] : memref<4x20x20xf32, #tpu.memory_space<vmem>>, vector<4x20x1xf32>
    %c0_40 = arith.constant 0 : index
    %c0_41 = arith.constant 0 : index
    %c19_42 = arith.constant 19 : index
    %17 = vector.load %arg4[%c0_40, %c0_41, %c19_42] : memref<4x20x20xf32, #tpu.memory_space<vmem>>, vector<4x20x1xf32>
    tpu.vector_store %arg4[%c0_40, %c0_41, %c19_42], %16 {strides = array<i32>} : memref<4x20x20xf32, #tpu.memory_space<vmem>>, vector<4x20x1xf32>,
    %c0_i32 = arith.constant 0 : i32
    %c16_i32 = arith.constant 16 : i32
    %18 = arith.muli %c0_i32, %c16_i32 : i32
    %c0_i32_43 = arith.constant 0 : i32
    %19 = arith.minsi %18, %c0_i32_43 : i32
    %20 = tpu.assume_multiple %19, 8 : i32
    %c0_44 = arith.constant 0 : index
    %21 = memref.load %arg2[%c0_44] : memref<5xf32, #tpu.memory_space<smem>>
    %c0_45 = arith.constant 0 : index
    %22 = arith.index_cast %20 : i32 to index
    %c0_46 = arith.constant 0 : index
    %23 = vector.load %arg4[%c0_45, %22, %c0_46] : memref<4x20x20xf32, #tpu.memory_space<vmem>>, vector<4x16x20xf32>
    %24 = vector.broadcast %21 : f32 to vector<4x16x20xf32>
    %25 = arith.mulf %24, %23 : vector<4x16x20xf32>
    %c1_47 = arith.constant 1 : index
    %26 = memref.load %arg2[%c1_47] : memref<5xf32, #tpu.memory_space<smem>>
    %c1_i32 = arith.constant 1 : i32
    %27 = arith.addi %20, %c1_i32 : i32
    %c0_48 = arith.constant 0 : index
    %28 = arith.index_cast %27 : i32 to index
    %c0_49 = arith.constant 0 : index
    %29 = vector.load %arg4[%c0_48, %28, %c0_49] : memref<4x20x20xf32, #tpu.memory_space<vmem>>, vector<4x16x20xf32>
    %30 = vector.broadcast %26 : f32 to vector<4x16x20xf32>
    %31 = arith.mulf %30, %29 : vector<4x16x20xf32>
    %32 = arith.addf %25, %31 : vector<4x16x20xf32>
    %c2_50 = arith.constant 2 : index
    %33 = memref.load %arg2[%c2_50] : memref<5xf32, #tpu.memory_space<smem>>
    %c2_i32 = arith.constant 2 : i32
    %34 = arith.addi %20, %c2_i32 : i32
    %c0_51 = arith.constant 0 : index
    %35 = arith.index_cast %34 : i32 to index
    %c0_52 = arith.constant 0 : index
    %36 = vector.load %arg4[%c0_51, %35, %c0_52] : memref<4x20x20xf32, #tpu.memory_space<vmem>>, vector<4x16x20xf32>
    %37 = vector.broadcast %33 : f32 to vector<4x16x20xf32>
    %38 = arith.mulf %37, %36 : vector<4x16x20xf32>
    %39 = arith.addf %32, %38 : vector<4x16x20xf32>
    %c3_53 = arith.constant 3 : index
    %40 = memref.load %arg2[%c3_53] : memref<5xf32, #tpu.memory_space<smem>>
    %c3_i32 = arith.constant 3 : i32
    %41 = arith.addi %20, %c3_i32 : i32
    %c0_54 = arith.constant 0 : index
    %42 = arith.index_cast %41 : i32 to index
    %c0_55 = arith.constant 0 : index
    %43 = vector.load %arg4[%c0_54, %42, %c0_55] : memref<4x20x20xf32, #tpu.memory_space<vmem>>, vector<4x16x20xf32>
    %44 = vector.broadcast %40 : f32 to vector<4x16x20xf32>
    %45 = arith.mulf %44, %43 : vector<4x16x20xf32>
    %46 = arith.addf %39, %45 : vector<4x16x20xf32>
    %c4_56 = arith.constant 4 : index
    %47 = memref.load %arg2[%c4_56] : memref<5xf32, #tpu.memory_space<smem>>
    %c4_i32 = arith.constant 4 : i32
    %48 = arith.addi %20, %c4_i32 : i32
    %c0_57 = arith.constant 0 : index
    %49 = arith.index_cast %48 : i32 to index
    %c0_58 = arith.constant 0 : index
    %50 = vector.load %arg4[%c0_57, %49, %c0_58] : memref<4x20x20xf32, #tpu.memory_space<vmem>>, vector<4x16x20xf32>
    %51 = vector.broadcast %47 : f32 to vector<4x16x20xf32>
    %52 = arith.mulf %51, %50 : vector<4x16x20xf32>
    %53 = arith.addf %46, %52 : vector<4x16x20xf32>
    %c0_59 = arith.constant 0 : index
    %54 = memref.load %arg2[%c0_59] : memref<5xf32, #tpu.memory_space<smem>>
    %55 = vector.extract_strided_slice %53 {offsets = [0, 0, 0], sizes = [4, 16, 16], strides = [1, 1, 1]} : vector<4x16x20xf32> to vector<4x16x16xf32>
    %56 = vector.broadcast %54 : f32 to vector<4x16x16xf32>
    %57 = arith.mulf %56, %55 : vector<4x16x16xf32>
    %c1_60 = arith.constant 1 : index
    %58 = memref.load %arg2[%c1_60] : memref<5xf32, #tpu.memory_space<smem>>
    %59 = vector.extract_strided_slice %53 {offsets = [0, 0, 1], sizes = [4, 16, 16], strides = [1, 1, 1]} : vector<4x16x20xf32> to vector<4x16x16xf32>
    %60 = vector.broadcast %58 : f32 to vector<4x16x16xf32>
    %61 = arith.mulf %60, %59 : vector<4x16x16xf32>
    %62 = arith.addf %57, %61 : vector<4x16x16xf32>
    %c2_61 = arith.constant 2 : index
    %63 = memref.load %arg2[%c2_61] : memref<5xf32, #tpu.memory_space<smem>>
    %64 = vector.extract_strided_slice %53 {offsets = [0, 0, 2], sizes = [4, 16, 16], strides = [1, 1, 1]} : vector<4x16x20xf32> to vector<4x16x16xf32>
    %65 = vector.broadcast %63 : f32 to vector<4x16x16xf32>
    %66 = arith.mulf %65, %64 : vector<4x16x16xf32>
    %67 = arith.addf %62, %66 : vector<4x16x16xf32>
    %c3_62 = arith.constant 3 : index
    %68 = memref.load %arg2[%c3_62] : memref<5xf32, #tpu.memory_space<smem>>
    %69 = vector.extract_strided_slice %53 {offsets = [0, 0, 3], sizes = [4, 16, 16], strides = [1, 1, 1]} : vector<4x16x20xf32> to vector<4x16x16xf32>
    %70 = vector.broadcast %68 : f32 to vector<4x16x16xf32>
    %71 = arith.mulf %70, %69 : vector<4x16x16xf32>
    %72 = arith.addf %67, %71 : vector<4x16x16xf32>
    %c4_63 = arith.constant 4 : index
    %73 = memref.load %arg2[%c4_63] : memref<5xf32, #tpu.memory_space<smem>>
    %74 = vector.extract_strided_slice %53 {offsets = [0, 0, 4], sizes = [4, 16, 16], strides = [1, 1, 1]} : vector<4x16x20xf32> to vector<4x16x16xf32>
    %75 = vector.broadcast %73 : f32 to vector<4x16x16xf32>
    %76 = arith.mulf %75, %74 : vector<4x16x16xf32>
    %77 = arith.addf %72, %76 : vector<4x16x16xf32>
    %c0_64 = arith.constant 0 : index
    %78 = arith.index_cast %20 : i32 to index
    %c0_65 = arith.constant 0 : index
    %79 = vector.load %arg3[%c0_64, %78, %c0_65] : memref<4x16x16xf32, #tpu.memory_space<vmem>>, vector<4x16x16xf32>
    tpu.vector_store %arg3[%c0_64, %78, %c0_65], %77 {strides = array<i32>} : memref<4x16x16xf32, #tpu.memory_space<vmem>>, vector<4x16x16xf32>,
    %c1_i32_66 = arith.constant 1 : i32
    return
  }
  func.func @transform_0(%arg0: i32) -> (i32, i32, i32) {
    %c0_i32 = arith.constant 0 : i32
    %c0_i32_0 = arith.constant 0 : i32
    %c0_i32_1 = arith.constant 0 : i32
    return %arg0, %c0_i32, %c0_i32_0 : i32, i32, i32
  }
  func.func @transform_1(%arg0: i32) -> i32 {
    %c0_i32 = arith.constant 0 : i32
    %c0_i32_0 = arith.constant 0 : i32
    return %c0_i32 : i32
  }
  func.func @transform_2(%arg0: i32) -> (i32, i32, i32) {
    %c0_i32 = arith.constant 0 : i32
    %c0_i32_0 = arith.constant 0 : i32
    %c0_i32_1 = arith.constant 0 : i32
    return %arg0, %c0_i32, %c0_i32_0 : i32, i32, i32
  }
}

</mosaic_0001>

<bundles_post_ra>
// kernel: tpu_custom_call.1
= control target key start
LH: loop header
LB: loop body
LE: loop exit
PB: predicated region body
PF: predicated region fallthrough
CT: control target
= control target key end

     0   :  { %7 = vsyncpa [#allocation4], 0  ;;  %s1864_s0 = inlined_call_operand.hbm [shape: f32[8,16,16], index: 0, kind: input, shape index: {}]   ;;  %s1865_s1 = inlined_call_operand.vmem [shape: f32[5], index: 1, kind: input, shape index: {}]   ;;  %s1866_s2 = inlined_call_operand.hbm [shape: f32[8,16,16], index: 2, kind: output, shape index: {}]  }
   0x1   :  { %9 = vsyncpa [#allocation4 + $0x1], 0 }
   0x2   :  { %10 = vsyncpa [#allocation6], 0 }
   0x3   :  { %11 = vsyncpa [#allocation5], 0 }
   0x4   :  { %13 = vsyncpa [#allocation5 + $0x1], 0  ;;  %s1302_s9 = smov 0   ;;  %s1304_s10 = smov 0  }
   0x5   :  { %s1306_s11 = smov 0   ;;  %s1308_s12 = smov 0  }
   0x6 LB: > { %s1323_s13 = sadd.s32 4294967295, %s1272_s12   ;;  %s1064_s14 = sadd.s32 4294967294, %s1272_s12   ;;  %s1272_s12 = sphi %s1308_s12, %s1886_s12   ;;  %s1268_s11 = sphi %s1306_s11, %s1885_s11   ;;  %s1264_s10 = sphi %s1304_s10, %s1884_s10   ;;  %s1260_s9 = sphi %s1302_s9, %s1883_s9  }
   0x7   : > { %s1327_s15 = sadd.s32 1, %s1272_s12   ;;  %s26_s16 = sadd.s32 1, %s1268_s11 }
   0x8   : > { %s23_s17 = ssub.s32 %s1272_s12, %s1327_s15  ;;  %p33_p0 = scmp.ne.s32.totalorder %s1268_s11, %s1264_s10 }
   0x9   : > { %p24_p1 = scmp.eq.s32.totalorder %s23_s17, 0  ;;  %p34_p2 = scmp.eq.s32.totalorder %s1272_s12, 0 }
   0xa   : > { %p39_p3 = scmp.ne.s32.totalorder %s1264_s10, %s1260_s9  ;;  %p1868_p4 = scmp.eq.s32.totalorder %s1323_s13, 0 }
   0xb   : > { %s1339_s18 = scalar_select %p24_p1, %s1268_s11, %s26_s16  }
   0xc   : > { %p1341_p5 = por %p34_p2, %p33_p0  ;;  %p1347_p6 = por %p1868_p4, %p39_p3 }
   0xd   : > { %p84_p7 = scmp.eq.s32.totalorder %s1323_s13, 1  ;;  %p90_p8 = scmp.eq.s32.totalorder %s1064_s14, 1 }
   0xe   : > { %s1871_s20 = scalar_select %p1347_p6, 1, 0 }
   0xf   : > { %p1065_p9 = scmp.ge.s32.totalorder %s1272_s12, 1  ;;  %p97_p10 = scmp.lt.s32.totalorder %s1272_s12, 3 }
  0x10   : > { %p1354_p11 = por %p84_p7, %p33_p0  ;;  %p1358_p12 = por %p90_p8, %p39_p3 }
  0x11   : > { %p1362_p13 = pnand %p1065_p9, %p97_p10  ;;  %s110_s26 = sshll.u32 %s1865_s1, 4  ;;  %s111_s26 = int_to_ptr.vmem [resolvable:$true] %s110_s26 }
  0x12   : > { %s1872_s21 = scalar_select %p1354_p11, 1, 0 }
  0x13   : > { %s1873_s22 = scalar_select %p1358_p12, 1, 0 }
  0x14   : > { %p1098_p1 = pneg %p1362_p13  ;;  %p1111_p2 = scmp.lt.s32.totalorder %s1272_s12, 2 }
  0x15   : > { %s121_s28 = sand.u32 1, %s1268_s11   ;;  %s1157_s3 = scalar_lea.vmem %s111_s26, 16 }
  0x16   : > { %p1375_p7 = pnand %p1098_p1, %p1868_p4  ;;  %p1382_p3 = pnand %p1111_p2, %p1341_p5 }
  0x17   : > { %s1068_s30 = sshll.u32 %s121_s28, 6  ;;  %p1158_p8 = scmp.ne.s32.totalorder %s111_s26, %s1157_s3 }
  0x18   : > { %p1159_p9 = pneg %p1375_p7  ;;  %p1165_p12 = scmp.lt.s32.totalorder %s111_s26, %s111_s26 }
  0x19   : > { %p1166_p11 = scmp.lt.s32.totalorder %s1157_s3, %s1157_s3 }
  0x1a   : > { %p1160_p10 = pnand %p1159_p9, %p1158_p8 }
  0x1b   : > { %p1167_p1 = por %p1166_p11, %p1165_p12 }
  0x1c   : > { %p1161_p0 = pneg %p1160_p10 }
  0x1e   : > { %p1168_p4 = pnand %p1167_p1, %p1161_p0 }
  0x20   : > { %1171 = shalt.err (!%p1168_p4)
}
  0x21   : > { %s1274_s4 = smov [#allocation7]   ;;  %s1087_s5 = sshll.u32 %s1272_s12, 10 }
  0x22   : > { %1101 = dma.vmem_to_smem (!%p1375_p7), %s111_s26, 16, %s1274_s4, [#allocation6]  }
  0x23   : > { %s125_s6 = scalar_lea.vmem [#allocation3], %s1068_s30  ;;  %s1394_s16 = scalar_lea.hbm %s1864_s0, %s1087_s5 }
  0x24   : > { %s133_s7 = sshll.u32 %s125_s6, 4  ;;  %s1398_s17 = scalar_lea.sflag [#allocation4], %s121_s28  ;;  %s1396_s7 = int_to_ptr.vmem [resolvable:$true] %s133_s7 }
  0x25   : > { %s1172_s19 = scalar_lea.hbm %s1394_s16, 1024  ;;  %p1174_p5 = pneg %p1382_p3 }
  0x26   : > { %p1173_p4 = scmp.ne.s32.totalorder %s1394_s16, %s1172_s19  ;;  %s1177_s26 = scalar_lea.hbm %s1864_s0, 2048 }
  0x27   : > { %p1178_p0 = scmp.lt.u32.totalorder %s1394_s16, %s1864_s0  ;;  %p1179_p2 = scmp.lt.u32.totalorder %s1177_s26, %s1172_s19 }
  0x28   : > { %p1175_p11 = pnand %p1174_p5, %p1173_p4  ;;  %p1181_p8 = scmp.lt.u32.totalorder %s1172_s19, %s1394_s16 }
  0x29   : > { %p1180_p7 = por %p1179_p2, %p1178_p0 }
  0x2a   : > { %p1176_p12 = pneg %p1175_p11 }
  0x2b   : > { %p1182_p9 = por %p1181_p8, %p1180_p7 }
  0x2d   : > { %p1183_p10 = pnand %p1182_p9, %p1176_p12 }
  0x2f   : > { %1186 = shalt.err (!%p1183_p10)
}
  0x30   : > { %s1187_s28 = scalar_lea.vmem %s1396_s7, 1024  ;;  %s1275_s3 = smov [#allocation3]  }
  0x31   : > { %p1188_p1 = scmp.ne.s32.totalorder %s1396_s7, %s1187_s28  ;;  %s1192_s4 = sshll.u32 %s1275_s3, 4  ;;  %s1193_s4 = int_to_ptr.vmem [resolvable:$false] %s1192_s4 }
  0x32   : > { %s1194_s5 = scalar_lea.vmem %s1193_s4, 2048  ;;  %p1195_p6 = scmp.lt.s32.totalorder %s1396_s7, %s1193_s4 }
  0x33   : > { %p1190_p4 = pnand %p1188_p1, %p1174_p5  ;;  %p1196_p0 = scmp.lt.s32.totalorder %s1194_s5, %s1187_s28 }
  0x35   : > { %p1191_p11 = pneg %p1190_p4  ;;  %p1197_p2 = por %p1196_p0, %p1195_p6 }
  0x37   : > { %p1198_p7 = pnand %p1197_p2, %p1191_p11 }
  0x39   : > { %1201 = shalt.err (!%p1198_p7)
}
  0x3a   : > { %s1276_s6 = smov 128   ;;  %s1277_s8 = smov 8  }
  0x3b   : > { %1105 = dma.hbm_to_vmem [thread:$0]  (!%p1382_p3), %s1394_s16, 1024, %s1396_s7, %s1398_s17, %s1276_s6, %s1276_s6, %s1277_s8  }
  0x3c   : > { %145 = sbr.rel (%p1362_p13) target bundleno = 940 (0x3ac), region = 28  ;;  %s1429_s14 = sand.u32 (!%p1362_p13), 1, %s1264_s10  }
  0x3d   : > { %s1073_s19 = sshll.u32 (!%p1362_p13), %s1429_s14, 6  ;;  %s148_s24 = scalar_lea.sflag (!%p1362_p13), [#allocation4], %s1429_s14 }
  0x3e   : > { %s1435_s25 = scalar_lea.vmem (!%p1362_p13), [#allocation3], %s1073_s19  ;;  %p1877_p6 = scmp.ne.s32.totalorder (!%p1362_p13), %s1871_s20, 0 }
  0x43   : > { %1247 = dma.done.wait (%p1877_p6), %s148_s24, 1024  }
  0x44   : > { %1249 = vsyncadd (%p1877_p6), %s148_s24, 4294966272  ;;  %p1878_p3 = scmp.eq.s32.totalorder %s1323_s13, 0 }
  0x46   : > { %1251 = dma.done.wait (%p1878_p3), [#allocation6], 16   ;;  %p1879_p13 = pmov %p1878_p3 }
  0x48   : > { %1253 = vsyncadd (%p1879_p13), [#allocation6], 4294967280 }
  0x49   : > { %160 = sfence }
  0x4a   : > { %v181_v0 = vld [vmem:[%s1435_s25 + $0x10] sm:$0xff]  ;;  %v179_v1 = vld [vmem:[%s1435_s25] sm:$0xff]  ;;  %s1278_s20 = smov 2   ;;  %v182_v2 = vld [vmem:[%s1435_s25 + $0x18] sm:$0xff]  ;;  %vm219_vm0 = vcmask 146448   ;;  %s1279_s23 = smov 124  }
  0x4b   : > { %199 = vrot.lane.b32.xlu1 %v181_v0, %s1278_s20  ;;  %195 = vrot.lane.b32.xlu0 %v179_v1, %s1278_s20  ;;  %v180_v3 = vld [vmem:[%s1435_s25 + $0x8] sm:$0xff]  ;;  %v183_v5 = vld [vmem:[%s1435_s25 + $0x20] sm:$0xff]  ;;  %vm248_vm1 = vcmask 139280   ;;  %vm385_vm2 = vcmask 7168   ;;  %vm388_vm3 = vcmask 3072   ;;  %vm459_vm4 = vcmask 154768  }
  0x4c   : > { %v184_v4 = vld [vmem:[%s1435_s25 + $0x28] sm:$0xff]  ;;  %v186_v6 = vld [vmem:[%s1435_s25 + $0x38] sm:$0xff]  ;;  %v185_v7 = vld [vmem:[%s1435_s25 + $0x30] sm:$0xff]  ;;  %s1280_s29 = smov 126   ;;  %vm462_vm5 = vcmask 150672   ;;  %vm533_vm6 = vcmask 15368  }
  0x4d   : > { %v229_v8 = vld [vmem:[%s1435_s25 + $0x12] sm:$0x1]  ;;  %v228_v9 = vld [vmem:[%s1435_s25 + $0x2] sm:$0x1]  ;;  %v254_v12 = vld [vmem:[%s1435_s25 + $0x1e] sm:$0x1] }
  0x4e   : > { %v231_v10 = vld [vmem:[%s1435_s25 + $0x32] sm:$0x1]  ;;  %v230_v11 = vld [vmem:[%s1435_s25 + $0x22] sm:$0x1]  ;;  %v253_v13 = vld [vmem:[%s1435_s25 + $0xe] sm:$0x1] }
  0x4f   : > { %201 = vrot.lane.b32.xlu1 %v182_v2, %s1278_s20  ;;  %197 = vrot.lane.b32.xlu0 %v180_v3, %s1278_s20  ;;  %v256_v14 = vld [vmem:[%s1435_s25 + $0x3e] sm:$0x1]  ;;  %v255_v15 = vld [vmem:[%s1435_s25 + $0x2e] sm:$0x1]  ;;  %s1281_s7 = smov 4   ;;  %vm536_vm7 = vcmask 11272  }
  0x50   : > { %v278_v16 = vld [vmem:[%s1435_s25 + $0x11] sm:$0x1]  ;;  %v277_v17 = vld [vmem:[%s1435_s25 + $0x1] sm:$0x1]  ;;  %v302_v20 = vld [vmem:[%s1435_s25 + $0x1d] sm:$0x1] }
  0x51   : > { %v280_v18 = vld [vmem:[%s1435_s25 + $0x31] sm:$0x1]  ;;  %v279_v19 = vld [vmem:[%s1435_s25 + $0x21] sm:$0x1]  ;;  %v301_v21 = vld [vmem:[%s1435_s25 + $0xd] sm:$0x1] }
  0x52   : > { %v304_v22 = vld [vmem:[%s1435_s25 + $0x3d] sm:$0x1]  ;;  %v303_v23 = vld [vmem:[%s1435_s25 + $0x2d] sm:$0x1]  ;;  %vm607_vm8 = vcmask 162968   ;;  %s1076_s16 = sld [smem:[#allocation7 + $0x1]] }
  0x53   : > { %205 = vrot.lane.b32.xlu1 %v184_v4, %s1278_s20  ;;  %203 = vrot.lane.b32.xlu0 %v183_v5, %s1278_s20  ;;  %s621_s17 = sld [smem:[#allocation7]]  ;;  %s1077_s26 = sld [smem:[#allocation7 + $0x2]]  ;;  %vm610_vm9 = vcmask 158872   ;;  %vm951_vm10 = vcmask 130048  }
  0x54   : > { %s1078_s27 = sld [smem:[#allocation7 + $0x3]]  ;;  %s1079_s30 = sld [smem:[#allocation7 + $0x4]] }
  0x55   : > { %s1282_s28 = smov 127   ;;  %s1283_s3 = smov 125  }
  0x56   : > { %s1792_s4 = scalar_lea.vmem [#allocation8], %s1073_s19  ;;  %s1089_s5 = sshll.u32 %s1323_s13, 10 }
  0x57   : > { %209 = vrot.lane.b32.xlu1 %v186_v6, %s1278_s20  ;;  %207 = vrot.lane.b32.xlu0 %v185_v7, %s1278_s20  ;;  %s975_s6 = sshll.u32 %s1792_s4, 4  ;;  %s1814_s24 = scalar_lea.hbm %s1866_s2, %s1089_s5  ;;  %s1816_s6 = int_to_ptr.vmem [resolvable:$true] %s975_s6 }
  0x58   : > { %s961_s13 = scalar_lea.sflag [#allocation5], %s1429_s14  ;;  %s1202_s25 = scalar_lea.vmem %s1816_s6, 1024 }
  0x59   : > { %p1203_p5 = scmp.ne.s32.totalorder %s1816_s6, %s1202_s25  ;;  %p1880_p12 = scmp.ne.s32.totalorder %s1872_s21, 0 }
  0x5b   : > { %238 = vrot.lane.b32.xlu1 %v229_v8, %s1278_s20  ;;  %236 = vrot.lane.b32.xlu0 %v228_v9, %s1278_s20  ;;  %p1204_p8 = pnand %p1203_p5, %p1880_p12 }
  0x5d   : > { %p1205_p9 = pneg %p1204_p8 }
  0x5f   : > { %242 = vrot.lane.b32.xlu1 %v231_v10, %s1278_s20  ;;  %240 = vrot.lane.b32.xlu0 %v230_v11, %s1278_s20 }
  0x63   : > { %263 = vrot.lane.b32.xlu1 %v254_v12, %s1278_s20  ;;  %261 = vrot.lane.b32.xlu0 %v253_v13, %s1278_s20 }
  0x67   : > { %267 = vrot.lane.b32.xlu1 %v256_v14, %s1278_s20  ;;  %265 = vrot.lane.b32.xlu0 %v255_v15, %s1278_s20 }
  0x6b   : > { %287 = vrot.lane.b32.xlu1 %v278_v16, %s1278_s20  ;;  %285 = vrot.lane.b32.xlu0 %v277_v17, %s1278_s20 }
  0x6f   : > { %291 = vrot.lane.b32.xlu1 %v280_v18, %s1278_s20  ;;  %289 = vrot.lane.b32.xlu0 %v279_v19, %s1278_s20 }
  0x73   : > { %311 = vrot.lane.b32.xlu1 %v302_v20, %s1278_s20  ;;  %309 = vrot.lane.b32.xlu0 %v301_v21, %s1278_s20 }
  0x77   : > { %315 = vrot.lane.b32.xlu1 %v304_v22, %s1278_s20  ;;  %313 = vrot.lane.b32.xlu0 %v303_v23, %s1278_s20 }
  0xbd   : > { %v200_v24 = vpop.permute.xlu1 %199  ;;  %v196_v25 = vpop.permute.xlu0 %195 }
  0xbe   : > { %222 = vst.msk [vmem:[#allocation2 + $0x1a] sm:$0xff] %vm219_vm0, %v200_v24  ;;  %220 = vst.msk [vmem:[#allocation2 + $0x2] sm:$0xff] %vm219_vm0, %v196_v25 }
  0xc1   : > { %v202_v26 = vpop.permute.xlu1 %201  ;;  %v198_v27 = vpop.permute.xlu0 %197 }
  0xc2   : > { %223 = vst.msk [vmem:[#allocation2 + $0x22] sm:$0xff] %vm219_vm0, %v202_v26  ;;  %221 = vst.msk [vmem:[#allocation2 + $0xa] sm:$0xff] %vm219_vm0, %v198_v27 }
  0xc5   : > { %v206_v28 = vpop.permute.xlu1 %205  ;;  %v204_v29 = vpop.permute.xlu0 %203 }
  0xc6   : > { %225 = vst.msk [vmem:[#allocation2 + $0x3a] sm:$0xff] %vm219_vm0, %v206_v28  ;;  %224 = vst.msk [vmem:[#allocation2 + $0x32] sm:$0xff] %vm219_vm0, %v204_v29 }
  0xc9   : > { %v210_v30 = vpop.permute.xlu1 %209  ;;  %v208_v31 = vpop.permute.xlu0 %207  ;;  %v326_v32 = vld [vmem:[#allocation2 + $0x8] sm:$0xff]  ;;  %v329_v54 = vld [vmem:[#allocation2 + $0x20] sm:$0xff] }
  0xca   : > { %227 = vst.msk [vmem:[#allocation2 + $0x52] sm:$0xff] %vm219_vm0, %v210_v30  ;;  %226 = vst.msk [vmem:[#allocation2 + $0x4a] sm:$0xff] %vm219_vm0, %v208_v31  ;;  %351 = vrot.lane.b32.xlu1 %v326_v32, %s1279_s23 }
  0xcd   : > { %v239_v33 = vpop.permute.xlu1 %238  ;;  %v237_v34 = vpop.permute.xlu0 %236  ;;  %v332_v53 = vld [vmem:[#allocation2 + $0x38] sm:$0xff] }
  0xce   : > { %250 = vst.msk [vmem:[#allocation2 + $0x18] sm:$0x1] %vm248_vm1, %v239_v33  ;;  %249 = vst.msk [vmem:[#allocation2] sm:$0x1] %vm248_vm1, %v237_v34 }
  0xd1   : > { %v243_v35 = vpop.permute.xlu1 %242  ;;  %v241_v36 = vpop.permute.xlu0 %240  ;;  %v335_v59 = vld [vmem:[#allocation2 + $0x50] sm:$0xff] }
  0xd2   : > { %252 = vst.msk [vmem:[#allocation2 + $0x48] sm:$0x1] %vm248_vm1, %v243_v35  ;;  %251 = vst.msk [vmem:[#allocation2 + $0x30] sm:$0x1] %vm248_vm1, %v241_v36 }
  0xd5   : > { %v264_v37 = vpop.permute.xlu1 %263  ;;  %v262_v38 = vpop.permute.xlu0 %261 }
  0xd6   : > { %274 = vst.msk [vmem:[#allocation2 + $0x2a] sm:$0x1] %vm248_vm1, %v264_v37  ;;  %273 = vst.msk [vmem:[#allocation2 + $0x12] sm:$0x1] %vm248_vm1, %v262_v38 }
  0xd9   : > { %v268_v39 = vpop.permute.xlu1 %267  ;;  %v266_v40 = vpop.permute.xlu0 %265 }
  0xda   : > { %276 = vst.msk [vmem:[#allocation2 + $0x5a] sm:$0x1] %vm248_vm1, %v268_v39  ;;  %275 = vst.msk [vmem:[#allocation2 + $0x42] sm:$0x1] %vm248_vm1, %v266_v40 }
  0xdd   : > { %v288_v41 = vpop.permute.xlu1 %287  ;;  %v286_v42 = vpop.permute.xlu0 %285 }
  0xde   : > { %298 = vst.msk [vmem:[#allocation2 + $0x19] sm:$0x1] %vm248_vm1, %v288_v41  ;;  %297 = vst.msk [vmem:[#allocation2 + $0x1] sm:$0x1] %vm248_vm1, %v286_v42 }
  0xe1   : > { %v292_v43 = vpop.permute.xlu1 %291  ;;  %v290_v44 = vpop.permute.xlu0 %289 }
  0xe2   : > { %300 = vst.msk [vmem:[#allocation2 + $0x49] sm:$0x1] %vm248_vm1, %v292_v43  ;;  %299 = vst.msk [vmem:[#allocation2 + $0x31] sm:$0x1] %vm248_vm1, %v290_v44 }
  0xe5   : > { %v312_v45 = vpop.permute.xlu1 %311  ;;  %v310_v46 = vpop.permute.xlu0 %309  ;;  %v328_v47 = vld [vmem:[#allocation2 + $0x18] sm:$0xff]  ;;  %v325_v48 = vld [vmem:[#allocation2] sm:$0xff] }
  0xe6   : > { %322 = vst.msk [vmem:[#allocation2 + $0x2b] sm:$0x1] %vm248_vm1, %v312_v45  ;;  %321 = vst.msk [vmem:[#allocation2 + $0x13] sm:$0x1] %vm248_vm1, %v310_v46  ;;  %355 = vrot.lane.b32.xlu1 %v328_v47, %s1279_s23  ;;  %349 = vrot.lane.b32.xlu0 %v325_v48, %s1279_s23 }
  0xe9   : > { %v316_v49 = vpop.permute.xlu1 %315  ;;  %v314_v50 = vpop.permute.xlu0 %313  ;;  %v334_v55 = vld [vmem:[#allocation2 + $0x48] sm:$0xff]  ;;  %v331_v56 = vld [vmem:[#allocation2 + $0x30] sm:$0xff] }
  0xea   : > { %324 = vst.msk [vmem:[#allocation2 + $0x5b] sm:$0x1] %vm248_vm1, %v316_v49  ;;  %323 = vst.msk [vmem:[#allocation2 + $0x43] sm:$0x1] %vm248_vm1, %v314_v50 }
  0xed   : > { %v330_v51 = vld [vmem:[#allocation2 + $0x28] sm:$0xf]  ;;  %v327_v52 = vld [vmem:[#allocation2 + $0x10] sm:$0xf] }
  0xee   : > { %359 = vrot.lane.b32.xlu1 %v330_v51, %s1279_s23  ;;  %353 = vrot.lane.b32.xlu0 %v327_v52, %s1279_s23 }
  0xf1   : > { %v336_v57 = vld [vmem:[#allocation2 + $0x58] sm:$0xf]  ;;  %v333_v58 = vld [vmem:[#allocation2 + $0x40] sm:$0xf] }
  0xf2   : > { %363 = vrot.lane.b32.xlu1 %v332_v53, %s1279_s23  ;;  %357 = vrot.lane.b32.xlu0 %v329_v54, %s1279_s23 }
  0xf6   : > { %367 = vrot.lane.b32.xlu1 %v334_v55, %s1279_s23  ;;  %361 = vrot.lane.b32.xlu0 %v331_v56, %s1279_s23 }
  0xfa   : > { %371 = vrot.lane.b32.xlu1 %v336_v57, %s1279_s23  ;;  %365 = vrot.lane.b32.xlu0 %v333_v58, %s1279_s23 }
  0xfe   : > { %369 = vrot.lane.b32.xlu0 %v335_v59, %s1279_s23 }
 0x13c   : > { %v352_v60 = vpop.permute.xlu1 %351 }
 0x13d   : > { %387 = vst.msk [vmem:[#allocation2 + $0x8] sm:$0xff] %vm385_vm2, %v352_v60 }
 0x144   : > { %v400_v61 = vld [vmem:[#allocation2 + $0x8] sm:$0xff] }
 0x145   : > { %425 = vrot.lane.b32.xlu1 %v400_v61, %s1278_s20 }
 0x158   : > { %v356_v62 = vpop.permute.xlu1 %355  ;;  %v350_v63 = vpop.permute.xlu0 %349 }
 0x159   : > { %390 = vst.msk [vmem:[#allocation2 + $0x18] sm:$0xff] %vm385_vm2, %v356_v62  ;;  %386 = vst.msk [vmem:[#allocation2] sm:$0xff] %vm385_vm2, %v350_v63 }
 0x160   : > { %v360_v0 = vpop.permute.xlu1 %359  ;;  %v354_v1 = vpop.permute.xlu0 %353  ;;  %v402_v2 = vld [vmem:[#allocation2 + $0x18] sm:$0xff]  ;;  %v399_v3 = vld [vmem:[#allocation2] sm:$0xff] }
 0x161   : > { %392 = vst.msk [vmem:[#allocation2 + $0x28] sm:$0xf] %vm388_vm3, %v360_v0  ;;  %389 = vst.msk [vmem:[#allocation2 + $0x10] sm:$0xf] %vm388_vm3, %v354_v1  ;;  %429 = vrot.lane.b32.xlu1 %v402_v2, %s1278_s20  ;;  %423 = vrot.lane.b32.xlu0 %v399_v3, %s1278_s20 }
 0x164   : > { %v364_v4 = vpop.permute.xlu1 %363  ;;  %v358_v5 = vpop.permute.xlu0 %357 }
 0x165   : > { %394 = vst.msk [vmem:[#allocation2 + $0x38] sm:$0xff] %vm385_vm2, %v364_v4  ;;  %391 = vst.msk [vmem:[#allocation2 + $0x20] sm:$0xff] %vm385_vm2, %v358_v5 }
 0x168   : > { %v368_v6 = vpop.permute.xlu1 %367  ;;  %v362_v7 = vpop.permute.xlu0 %361  ;;  %v404_v8 = vld [vmem:[#allocation2 + $0x28] sm:$0xf]  ;;  %v401_v9 = vld [vmem:[#allocation2 + $0x10] sm:$0xf] }
 0x169   : > { %396 = vst.msk [vmem:[#allocation2 + $0x48] sm:$0xff] %vm385_vm2, %v368_v6  ;;  %393 = vst.msk [vmem:[#allocation2 + $0x30] sm:$0xff] %vm385_vm2, %v362_v7  ;;  %433 = vrot.lane.b32.xlu1 %v404_v8, %s1278_s20  ;;  %427 = vrot.lane.b32.xlu0 %v401_v9, %s1278_s20  ;;  %v1604_v7 = vstv %s1076_s16 }
 0x16c   : > { %v372_v10 = vpop.permute.xlu1 %371  ;;  %v366_v11 = vpop.permute.xlu0 %365  ;;  %v406_v12 = vld [vmem:[#allocation2 + $0x38] sm:$0xff]  ;;  %v403_v13 = vld [vmem:[#allocation2 + $0x20] sm:$0xff] }
 0x16d   : > { %398 = vst.msk [vmem:[#allocation2 + $0x58] sm:$0xf] %vm388_vm3, %v372_v10  ;;  %395 = vst.msk [vmem:[#allocation2 + $0x40] sm:$0xf] %vm388_vm3, %v366_v11  ;;  %437 = vrot.lane.b32.xlu1 %v406_v12, %s1278_s20  ;;  %431 = vrot.lane.b32.xlu0 %v403_v13, %s1278_s20  ;;  %v1606_v11 = vstv %s621_s17 }
 0x170   : > { %v370_v14 = vpop.permute.xlu0 %369  ;;  %v408_v15 = vld [vmem:[#allocation2 + $0x48] sm:$0xff]  ;;  %v405_v16 = vld [vmem:[#allocation2 + $0x30] sm:$0xff] }
 0x171   : > { %397 = vst.msk [vmem:[#allocation2 + $0x50] sm:$0xff] %vm385_vm2, %v370_v14  ;;  %441 = vrot.lane.b32.xlu1 %v408_v15, %s1278_s20  ;;  %435 = vrot.lane.b32.xlu0 %v405_v16, %s1278_s20  ;;  %v1608_v14 = vstv %s1077_s26 }
 0x174   : > { %v410_v17 = vld [vmem:[#allocation2 + $0x58] sm:$0xf]  ;;  %v407_v18 = vld [vmem:[#allocation2 + $0x40] sm:$0xf] }
 0x175   : > { %445 = vrot.lane.b32.xlu1 %v410_v17, %s1278_s20  ;;  %439 = vrot.lane.b32.xlu0 %v407_v18, %s1278_s20  ;;  %v1614_v18 = vstv %s1078_s27 }
 0x178   : > { %v409_v19 = vld [vmem:[#allocation2 + $0x50] sm:$0xff] }
 0x179   : > { %443 = vrot.lane.b32.xlu0 %v409_v19, %s1278_s20  ;;  %s1284_s20 = smov [#allocation8]  }
 0x1b7   : > { %v426_v20 = vpop.permute.xlu1 %425 }
 0x1b8   : > { %461 = vst.msk [vmem:[#allocation2 + $0x8] sm:$0xff] %vm459_vm4, %v426_v20 }
 0x1bf   : > { %v474_v21 = vld [vmem:[#allocation2 + $0x8] sm:$0xff] }
 0x1c0   : > { %499 = vrot.lane.b32.xlu1 %v474_v21, %s1280_s29 }
 0x1d3   : > { %v430_v22 = vpop.permute.xlu1 %429  ;;  %v424_v23 = vpop.permute.xlu0 %423 }
 0x1d4   : > { %464 = vst.msk [vmem:[#allocation2 + $0x18] sm:$0xff] %vm459_vm4, %v430_v22  ;;  %460 = vst.msk [vmem:[#allocation2] sm:$0xff] %vm459_vm4, %v424_v23 }
 0x1db   : > { %v434_v24 = vpop.permute.xlu1 %433  ;;  %v428_v25 = vpop.permute.xlu0 %427  ;;  %v476_v26 = vld [vmem:[#allocation2 + $0x18] sm:$0xff]  ;;  %v473_v27 = vld [vmem:[#allocation2] sm:$0xff] }
 0x1dc   : > { %466 = vst.msk [vmem:[#allocation2 + $0x28] sm:$0xf] %vm462_vm5, %v434_v24  ;;  %463 = vst.msk [vmem:[#allocation2 + $0x10] sm:$0xf] %vm462_vm5, %v428_v25  ;;  %503 = vrot.lane.b32.xlu1 %v476_v26, %s1280_s29  ;;  %497 = vrot.lane.b32.xlu0 %v473_v27, %s1280_s29  ;;  %v1617_v24 = vstv %s1079_s30 }
 0x1df   : > { %v438_v28 = vpop.permute.xlu1 %437  ;;  %v432_v29 = vpop.permute.xlu0 %431 }
 0x1e0   : > { %468 = vst.msk [vmem:[#allocation2 + $0x38] sm:$0xff] %vm459_vm4, %v438_v28  ;;  %465 = vst.msk [vmem:[#allocation2 + $0x20] sm:$0xff] %vm459_vm4, %v432_v29 }
 0x1e3   : > { %v442_v30 = vpop.permute.xlu1 %441  ;;  %v436_v31 = vpop.permute.xlu0 %435  ;;  %v478_v32 = vld [vmem:[#allocation2 + $0x28] sm:$0xf]  ;;  %v475_v33 = vld [vmem:[#allocation2 + $0x10] sm:$0xf] }
 0x1e4   : > { %470 = vst.msk [vmem:[#allocation2 + $0x48] sm:$0xff] %vm459_vm4, %v442_v30  ;;  %467 = vst.msk [vmem:[#allocation2 + $0x30] sm:$0xff] %vm459_vm4, %v436_v31  ;;  %507 = vrot.lane.b32.xlu1 %v478_v32, %s1280_s29  ;;  %501 = vrot.lane.b32.xlu0 %v475_v33, %s1280_s29 }
 0x1e7   : > { %v446_v34 = vpop.permute.xlu1 %445  ;;  %v440_v35 = vpop.permute.xlu0 %439  ;;  %v480_v36 = vld [vmem:[#allocation2 + $0x38] sm:$0xff]  ;;  %v477_v37 = vld [vmem:[#allocation2 + $0x20] sm:$0xff] }
 0x1e8   : > { %472 = vst.msk [vmem:[#allocation2 + $0x58] sm:$0xf] %vm462_vm5, %v446_v34  ;;  %469 = vst.msk [vmem:[#allocation2 + $0x40] sm:$0xf] %vm462_vm5, %v440_v35  ;;  %511 = vrot.lane.b32.xlu1 %v480_v36, %s1280_s29  ;;  %505 = vrot.lane.b32.xlu0 %v477_v37, %s1280_s29 }
 0x1eb   : > { %v444_v38 = vpop.permute.xlu0 %443  ;;  %v482_v39 = vld [vmem:[#allocation2 + $0x48] sm:$0xff]  ;;  %v479_v40 = vld [vmem:[#allocation2 + $0x30] sm:$0xff] }
 0x1ec   : > { %471 = vst.msk [vmem:[#allocation2 + $0x50] sm:$0xff] %vm459_vm4, %v444_v38  ;;  %515 = vrot.lane.b32.xlu1 %v482_v39, %s1280_s29  ;;  %509 = vrot.lane.b32.xlu0 %v479_v40, %s1280_s29 }
 0x1ef   : > { %v484_v41 = vld [vmem:[#allocation2 + $0x58] sm:$0xf]  ;;  %v481_v42 = vld [vmem:[#allocation2 + $0x40] sm:$0xf] }
 0x1f0   : > { %519 = vrot.lane.b32.xlu1 %v484_v41, %s1280_s29  ;;  %513 = vrot.lane.b32.xlu0 %v481_v42, %s1280_s29 }
 0x1f3   : > { %v483_v43 = vld [vmem:[#allocation2 + $0x50] sm:$0xff] }
 0x1f4   : > { %517 = vrot.lane.b32.xlu0 %v483_v43, %s1280_s29 }
 0x232   : > { %v500_v44 = vpop.permute.xlu1 %499 }
 0x233   : > { %535 = vst.msk [vmem:[#allocation2 + $0x8] sm:$0xff] %vm533_vm6, %v500_v44 }
 0x23a   : > { %v548_v45 = vld [vmem:[#allocation2 + $0x8] sm:$0xff] }
 0x23b   : > { %573 = vrot.lane.b32.xlu1 %v548_v45, %s1281_s7 }
 0x24e   : > { %v504_v46 = vpop.permute.xlu1 %503  ;;  %v498_v47 = vpop.permute.xlu0 %497 }
 0x24f   : > { %538 = vst.msk [vmem:[#allocation2 + $0x18] sm:$0xff] %vm533_vm6, %v504_v46  ;;  %534 = vst.msk [vmem:[#allocation2] sm:$0xff] %vm533_vm6, %v498_v47 }
 0x256   : > { %v508_v48 = vpop.permute.xlu1 %507  ;;  %v502_v49 = vpop.permute.xlu0 %501  ;;  %v550_v50 = vld [vmem:[#allocation2 + $0x18] sm:$0xff]  ;;  %v547_v51 = vld [vmem:[#allocation2] sm:$0xff] }
 0x257   : > { %540 = vst.msk [vmem:[#allocation2 + $0x28] sm:$0xf] %vm536_vm7, %v508_v48  ;;  %537 = vst.msk [vmem:[#allocation2 + $0x10] sm:$0xf] %vm536_vm7, %v502_v49  ;;  %577 = vrot.lane.b32.xlu1 %v550_v50, %s1281_s7  ;;  %571 = vrot.lane.b32.xlu0 %v547_v51, %s1281_s7 }
 0x25a   : > { %v512_v52 = vpop.permute.xlu1 %511  ;;  %v506_v53 = vpop.permute.xlu0 %505 }
 0x25b   : > { %542 = vst.msk [vmem:[#allocation2 + $0x38] sm:$0xff] %vm533_vm6, %v512_v52  ;;  %539 = vst.msk [vmem:[#allocation2 + $0x20] sm:$0xff] %vm533_vm6, %v506_v53 }
 0x25e   : > { %v516_v54 = vpop.permute.xlu1 %515  ;;  %v510_v55 = vpop.permute.xlu0 %509  ;;  %v552_v56 = vld [vmem:[#allocation2 + $0x28] sm:$0xf]  ;;  %v549_v57 = vld [vmem:[#allocation2 + $0x10] sm:$0xf] }
 0x25f   : > { %544 = vst.msk [vmem:[#allocation2 + $0x48] sm:$0xff] %vm533_vm6, %v516_v54  ;;  %541 = vst.msk [vmem:[#allocation2 + $0x30] sm:$0xff] %vm533_vm6, %v510_v55  ;;  %581 = vrot.lane.b32.xlu1 %v552_v56, %s1281_s7  ;;  %575 = vrot.lane.b32.xlu0 %v549_v57, %s1281_s7 }
 0x262   : > { %v520_v58 = vpop.permute.xlu1 %519  ;;  %v514_v59 = vpop.permute.xlu0 %513  ;;  %v554_v60 = vld [vmem:[#allocation2 + $0x38] sm:$0xff]  ;;  %v551_v61 = vld [vmem:[#allocation2 + $0x20] sm:$0xff] }
 0x263   : > { %546 = vst.msk [vmem:[#allocation2 + $0x58] sm:$0xf] %vm536_vm7, %v520_v58  ;;  %543 = vst.msk [vmem:[#allocation2 + $0x40] sm:$0xf] %vm536_vm7, %v514_v59  ;;  %585 = vrot.lane.b32.xlu1 %v554_v60, %s1281_s7  ;;  %579 = vrot.lane.b32.xlu0 %v551_v61, %s1281_s7 }
 0x266   : > { %v518_v62 = vpop.permute.xlu0 %517  ;;  %v556_v63 = vld [vmem:[#allocation2 + $0x48] sm:$0xff]  ;;  %v553_v0 = vld [vmem:[#allocation2 + $0x30] sm:$0xff] }
 0x267   : > { %545 = vst.msk [vmem:[#allocation2 + $0x50] sm:$0xff] %vm533_vm6, %v518_v62  ;;  %589 = vrot.lane.b32.xlu1 %v556_v63, %s1281_s7  ;;  %583 = vrot.lane.b32.xlu0 %v553_v0, %s1281_s7 }
 0x26a   : > { %v558_v1 = vld [vmem:[#allocation2 + $0x58] sm:$0xf]  ;;  %v555_v2 = vld [vmem:[#allocation2 + $0x40] sm:$0xf] }
 0x26b   : > { %593 = vrot.lane.b32.xlu1 %v558_v1, %s1281_s7  ;;  %587 = vrot.lane.b32.xlu0 %v555_v2, %s1281_s7 }
 0x26e   : > { %v557_v3 = vld [vmem:[#allocation2 + $0x50] sm:$0xff] }
 0x26f   : > { %591 = vrot.lane.b32.xlu0 %v557_v3, %s1281_s7 }
 0x2ad   : > { %v574_v4 = vpop.permute.xlu1 %573 }
 0x2ae   : > { %609 = vst.msk [vmem:[#allocation2 + $0x8] sm:$0xff] %vm607_vm8, %v574_v4 }
 0x2b5   : > { %v623_v27 = vld [vmem:[#allocation2 + $0x8] sm:$0xff] }
 0x2b6   : > { %v632_v35 = vmul.f32 %v1606_v11, %v623_v27 }
 0x2c9   : > { %v578_v5 = vpop.permute.xlu1 %577  ;;  %v572_v6 = vpop.permute.xlu0 %571 }
 0x2ca   : > { %612 = vst.msk [vmem:[#allocation2 + $0x18] sm:$0xff] %vm607_vm8, %v578_v5  ;;  %608 = vst.msk [vmem:[#allocation2] sm:$0xff] %vm607_vm8, %v572_v6 }
 0x2d1   : > { %v582_v8 = vpop.permute.xlu1 %581  ;;  %v576_v9 = vpop.permute.xlu0 %575  ;;  %v622_v10 = vld [vmem:[#allocation2] sm:$0xff]  ;;  %v624_v38 = vld [vmem:[#allocation2 + $0x18] sm:$0xff] }
 0x2d2   : > { %v642_v12 = vld [vmem:[#allocation2 + $0x1] sm:$0xff]  ;;  %614 = vst.msk [vmem:[#allocation2 + $0x28] sm:$0xf] %vm610_vm9, %v582_v8  ;;  %611 = vst.msk [vmem:[#allocation2 + $0x10] sm:$0xf] %vm610_vm9, %v576_v9  ;;  %v631_v15 = vmul.f32 %v1606_v11, %v622_v10  ;;  %v633_v50 = vmul.f32 %v1606_v11, %v624_v38 }
 0x2d3   : > { %v670_v13 = vld [vmem:[#allocation2 + $0x2] sm:$0xff]  ;;  %v651_v16 = vmul.f32 %v1604_v7, %v642_v12 }
 0x2d4   : > { %v698_v17 = vld [vmem:[#allocation2 + $0x3] sm:$0xff]  ;;  %v679_v20 = vmul.f32 %v1608_v14, %v670_v13 }
 0x2d5   : > { %v659_v19 = vadd.f32 %v651_v16, %v631_v15  ;;  %v586_v21 = vpop.permute.xlu1 %585  ;;  %v580_v22 = vpop.permute.xlu0 %579  ;;  %v726_v23 = vld [vmem:[#allocation2 + $0x4] sm:$0xff]  ;;  %v707_v26 = vmul.f32 %v1614_v18, %v698_v17 }
 0x2d6   : > { %616 = vst.msk [vmem:[#allocation2 + $0x38] sm:$0xff] %vm607_vm8, %v586_v21  ;;  %613 = vst.msk [vmem:[#allocation2 + $0x20] sm:$0xff] %vm607_vm8, %v580_v22  ;;  %v735_v29 = vmul.f32 %v1617_v24, %v726_v23 }
 0x2d7   : > { %v687_v25 = vadd.f32 %v679_v20, %v659_v19 }
 0x2d9   : > { %v715_v28 = vadd.f32 %v707_v26, %v687_v25  ;;  %v590_v30 = vpop.permute.xlu1 %589  ;;  %v584_v31 = vpop.permute.xlu0 %583  ;;  %v643_v32 = vld [vmem:[#allocation2 + $0x9] sm:$0xff] }
 0x2da   : > { %v671_v33 = vld [vmem:[#allocation2 + $0xa] sm:$0xff]  ;;  %618 = vst.msk [vmem:[#allocation2 + $0x48] sm:$0xff] %vm607_vm8, %v590_v30  ;;  %615 = vst.msk [vmem:[#allocation2 + $0x30] sm:$0xff] %vm607_vm8, %v584_v31  ;;  %v652_v36 = vmul.f32 %v1604_v7, %v643_v32 }
 0x2db   : > { %v1625_v34 = vadd.f32 %v735_v29, %v715_v28  ;;  %v699_v37 = vld [vmem:[#allocation2 + $0xb] sm:$0xff]  ;;  %v680_v41 = vmul.f32 %v1608_v14, %v671_v33 }
 0x2dc   : > { %v660_v40 = vadd.f32 %v652_v36, %v632_v35  ;;  %v727_v44 = vld [vmem:[#allocation2 + $0xc] sm:$0xff]  ;;  %v708_v49 = vmul.f32 %v1614_v18, %v699_v37 }
 0x2dd   : > { %v759_v39 = vmul.f32 %v1625_v34, %v1604_v7  ;;  %v594_v42 = vpop.permute.xlu1 %593  ;;  %v588_v43 = vpop.permute.xlu0 %587  ;;  %v644_v45 = vld [vmem:[#allocation2 + $0x19] sm:$0xff]  ;;  %v1634_v47 = vmul.f32 %v1625_v34, %v1606_v11  ;;  %v645_v54 = vld [vmem:[#allocation2 + $0x21] sm:$0xff]  ;;  %v736_v59 = vmul.f32 %v1617_v24, %v727_v44 }
 0x2de   : > { %v672_v46 = vld [vmem:[#allocation2 + $0x1a] sm:$0xff]  ;;  %620 = vst.msk [vmem:[#allocation2 + $0x58] sm:$0xf] %vm610_vm9, %v594_v42  ;;  %617 = vst.msk [vmem:[#allocation2 + $0x40] sm:$0xf] %vm610_vm9, %v588_v43  ;;  %v688_v48 = vadd.f32 %v680_v41, %v660_v40  ;;  %v653_v51 = vmul.f32 %v1604_v7, %v644_v45  ;;  %v654_v56 = vmul.f32 %v1604_v7, %v645_v54  ;;  %v673_v57 = vld [vmem:[#allocation2 + $0x22] sm:$0xff] }
 0x2df   : > { %775 = vrot.lane.b32.xlu0 %v759_v39, %s1282_s28  ;;  %v700_v52 = vld [vmem:[#allocation2 + $0x1b] sm:$0xff]  ;;  %v681_v61 = vmul.f32 %v1608_v14, %v672_v46  ;;  %v701_v63 = vld [vmem:[#allocation2 + $0x23] sm:$0xff]  ;;  %v682_v3 = vmul.f32 %v1608_v14, %v673_v57 }
 0x2e0   : > { %v625_v53 = vld [vmem:[#allocation2 + $0x20] sm:$0xff]  ;;  %v716_v58 = vadd.f32 %v708_v49, %v688_v48  ;;  %v661_v60 = vadd.f32 %v653_v51, %v633_v50  ;;  %v709_v1 = vmul.f32 %v1614_v18, %v700_v52  ;;  %v627_v15 = vld [vmem:[#allocation2 + $0x38] sm:$0xff]  ;;  %v710_v19 = vmul.f32 %v1614_v18, %v701_v63 }
 0x2e1   : > { %v634_v55 = vmul.f32 %v1606_v11, %v625_v53  ;;  %v728_v62 = vld [vmem:[#allocation2 + $0x1c] sm:$0xff]  ;;  %v592_v0 = vpop.permute.xlu0 %591  ;;  %v626_v4 = vld [vmem:[#allocation2 + $0x30] sm:$0xff]  ;;  %v729_v10 = vld [vmem:[#allocation2 + $0x24] sm:$0xff]  ;;  %v636_v29 = vmul.f32 %v1606_v11, %v627_v15 }
 0x2e2   : > { %v646_v5 = vld [vmem:[#allocation2 + $0x31] sm:$0xff]  ;;  %619 = vst.msk [vmem:[#allocation2 + $0x50] sm:$0xff] %vm607_vm8, %v592_v0  ;;  %v1649_v8 = vadd.f32 %v736_v59, %v716_v58  ;;  %v689_v9 = vadd.f32 %v681_v61, %v661_v60  ;;  %v635_v12 = vmul.f32 %v1606_v11, %v626_v4  ;;  %v737_v16 = vmul.f32 %v1617_v24, %v728_v62  ;;  %v628_v37 = vld [vmem:[#allocation2 + $0x48] sm:$0xff] }
 0x2e3   : > { %v662_v2 = vadd.f32 %v654_v56, %v634_v55  ;;  %v674_v6 = vld [vmem:[#allocation2 + $0x32] sm:$0xff]  ;;  %v655_v13 = vmul.f32 %v1604_v7, %v646_v5  ;;  %v738_v28 = vmul.f32 %v1617_v24, %v729_v10  ;;  %v637_v49 = vmul.f32 %v1606_v11, %v628_v37 }
 0x2e4   : > { %v702_v20 = vld [vmem:[#allocation2 + $0x33] sm:$0xff]  ;;  %v760_v21 = vmul.f32 %v1649_v8, %v1604_v7  ;;  %v717_v22 = vadd.f32 %v709_v1, %v689_v9  ;;  %v683_v25 = vmul.f32 %v1608_v14, %v674_v6  ;;  %v1670_v41 = vmul.f32 %v1649_v8, %v1606_v11 }
 0x2e5   : > { %v690_v17 = vadd.f32 %v682_v3, %v662_v2  ;;  %v663_v23 = vadd.f32 %v655_v13, %v635_v12  ;;  %v730_v26 = vld [vmem:[#allocation2 + $0x34] sm:$0xff]  ;;  %v711_v35 = vmul.f32 %v1614_v18, %v702_v20  ;;  %v731_v46 = vld [vmem:[#allocation2 + $0x3c] sm:$0xff]  ;;  %v808_v37 = vmul.f32 %v1649_v8, %v1608_v14 }
 0x2e6   : > { %v647_v30 = vld [vmem:[#allocation2 + $0x39] sm:$0xff]  ;;  %777 = vrot.lane.b32.xlu1 %v760_v21, %s1282_s28  ;;  %v1661_v32 = vadd.f32 %v737_v16, %v717_v22  ;;  %v739_v39 = vmul.f32 %v1617_v24, %v730_v26  ;;  %v740_v58 = vmul.f32 %v1617_v24, %v731_v46 }
 0x2e7   : > { %v718_v27 = vadd.f32 %v710_v19, %v690_v17  ;;  %v675_v31 = vld [vmem:[#allocation2 + $0x3a] sm:$0xff]  ;;  %v691_v33 = vadd.f32 %v683_v25, %v663_v23  ;;  %v656_v36 = vmul.f32 %v1604_v7, %v647_v30 }
 0x2e8   : > { %v703_v40 = vld [vmem:[#allocation2 + $0x3b] sm:$0xff]  ;;  %v761_v42 = vmul.f32 %v1661_v32, %v1604_v7  ;;  %v684_v45 = vmul.f32 %v1608_v14, %v675_v31  ;;  %v1706_v25 = vmul.f32 %v1661_v32, %v1606_v11  ;;  %v857_v46 = vmul.f32 %v1661_v32, %v1614_v18 }
 0x2e9   : > { %v1665_v38 = vadd.f32 %v738_v28, %v718_v27  ;;  %v719_v43 = vadd.f32 %v711_v35, %v691_v33  ;;  %v664_v44 = vadd.f32 %v656_v36, %v636_v29  ;;  %v648_v50 = vld [vmem:[#allocation2 + $0x49] sm:$0xff]  ;;  %v712_v54 = vmul.f32 %v1614_v18, %v703_v40  ;;  %v649_v57 = vld [vmem:[#allocation2 + $0x51] sm:$0xff] }
 0x2ea   : > { %v676_v51 = vld [vmem:[#allocation2 + $0x4a] sm:$0xff]  ;;  %779 = vrot.lane.b32.xlu0 %v761_v42, %s1282_s28  ;;  %v657_v55 = vmul.f32 %v1604_v7, %v648_v50  ;;  %v658_v61 = vmul.f32 %v1604_v7, %v649_v57  ;;  %v677_v62 = vld [vmem:[#allocation2 + $0x52] sm:$0xff]  ;;  %v807_v36 = vmul.f32 %v1625_v34, %v1608_v14 }
 0x2eb   : > { %v762_v48 = vmul.f32 %v1665_v38, %v1604_v7  ;;  %v1679_v52 = vadd.f32 %v739_v39, %v719_v43  ;;  %v692_v53 = vadd.f32 %v684_v45, %v664_v44  ;;  %v629_v56 = vld [vmem:[#allocation2 + $0x50] sm:$0xff]  ;;  %v685_v2 = vmul.f32 %v1608_v14, %v676_v51 }
 0x2ec   : > { %v704_v59 = vld [vmem:[#allocation2 + $0x4b] sm:$0xff]  ;;  %v638_v60 = vmul.f32 %v1606_v11, %v629_v56  ;;  %v665_v1 = vadd.f32 %v657_v55, %v637_v49  ;;  %v705_v3 = vld [vmem:[#allocation2 + $0x53] sm:$0xff]  ;;  %v686_v6 = vmul.f32 %v1608_v14, %v677_v62  ;;  %v1698_v17 = vmul.f32 %v1665_v38, %v1606_v11 }
 0x2ed   : > { %781 = vrot.lane.b32.xlu1 %v762_v48, %s1282_s28  ;;  %v763_v63 = vmul.f32 %v1679_v52, %v1604_v7  ;;  %v720_v0 = vadd.f32 %v712_v54, %v692_v53  ;;  %v732_v4 = vld [vmem:[#allocation2 + $0x4c] sm:$0xff]  ;;  %v713_v12 = vmul.f32 %v1614_v18, %v704_v59  ;;  %v733_v13 = vld [vmem:[#allocation2 + $0x54] sm:$0xff]  ;;  %v714_v16 = vmul.f32 %v1614_v18, %v705_v3 }
 0x2ee   : > { %v666_v5 = vadd.f32 %v658_v61, %v638_v60  ;;  %v693_v10 = vadd.f32 %v685_v2, %v665_v1  ;;  %v741_v21 = vmul.f32 %v1617_v24, %v732_v4  ;;  %v742_v23 = vmul.f32 %v1617_v24, %v733_v13 }
 0x2ef   : > { %783 = vrot.lane.b32.xlu0 %v763_v63, %s1282_s28  ;;  %v1692_v9 = vadd.f32 %v740_v58, %v720_v0  ;;  %v1710_v26 = vmul.f32 %v1679_v52, %v1606_v11  ;;  %v810_v39 = vmul.f32 %v1665_v38, %v1608_v14  ;;  %v855_v44 = vmul.f32 %v1625_v34, %v1614_v18 }
 0x2f0   : > { %v694_v15 = vadd.f32 %v686_v6, %v666_v5  ;;  %v721_v20 = vadd.f32 %v713_v12, %v693_v10  ;;  %v856_v45 = vmul.f32 %v1649_v8, %v1614_v18  ;;  %v858_v48 = vmul.f32 %v1665_v38, %v1614_v18 }
 0x2f1   : > { %v764_v19 = vmul.f32 %v1692_v9, %v1604_v7  ;;  %v1715_v28 = vmul.f32 %v1692_v9, %v1606_v11  ;;  %v812_v40 = vmul.f32 %v1692_v9, %v1608_v14  ;;  %v860_v49 = vmul.f32 %v1692_v9, %v1614_v18 }
 0x2f2   : > { %v722_v22 = vadd.f32 %v714_v16, %v694_v15  ;;  %v749_v27 = vadd.f32 %v741_v21, %v721_v20  ;;  %v903_v53 = vmul.f32 %v1625_v34, %v1617_v24  ;;  %v904_v54 = vmul.f32 %v1649_v8, %v1617_v24 }
 0x2f3   : > { %785 = vrot.lane.b32.xlu1 %v764_v19, %s1282_s28  ;;  %v905_v55 = vmul.f32 %v1661_v32, %v1617_v24  ;;  %v906_v56 = vmul.f32 %v1665_v38, %v1617_v24  ;;  %v908_v34 = vmul.f32 %v1692_v9, %v1617_v24 }
 0x2f4   : > { %v750_v29 = vadd.f32 %v742_v23, %v722_v22  ;;  %v765_v30 = vmul.f32 %v749_v27, %v1604_v7  ;;  %v1724_v35 = vmul.f32 %v749_v27, %v1606_v11  ;;  %v813_v42 = vmul.f32 %v749_v27, %v1608_v14 }
 0x2f5   : > { %v861_v50 = vmul.f32 %v749_v27, %v1614_v18  ;;  %v909_v8 = vmul.f32 %v749_v27, %v1617_v24 }
 0x2f6   : > { %v766_v31 = vmul.f32 %v750_v29, %v1604_v7  ;;  %787 = vrot.lane.b32.xlu0 %v765_v30, %s1282_s28  ;;  %v1721_v33 = vmul.f32 %v750_v29, %v1606_v11  ;;  %v809_v7 = vmul.f32 %v1661_v32, %v1608_v14  ;;  %v811_v11 = vmul.f32 %v1679_v52, %v1608_v14 }
 0x2f7   : > { %v814_v43 = vmul.f32 %v750_v29, %v1608_v14  ;;  %v859_v14 = vmul.f32 %v1679_v52, %v1614_v18  ;;  %v862_v51 = vmul.f32 %v750_v29, %v1614_v18  ;;  %v907_v18 = vmul.f32 %v1679_v52, %v1617_v24 }
 0x2f8   : > { %789 = vrot.lane.b32.xlu1 %v766_v31, %s1282_s28  ;;  %v910_v32 = vmul.f32 %v750_v29, %v1617_v24 }
 0x2fa   : > { %823 = vrot.lane.b32.xlu0 %v807_v36, %s1280_s29 }
 0x2fc   : > { %825 = vrot.lane.b32.xlu1 %v808_v37, %s1280_s29 }
 0x2fe   : > { %827 = vrot.lane.b32.xlu0 %v809_v7, %s1280_s29 }
 0x300   : > { %829 = vrot.lane.b32.xlu1 %v810_v39, %s1280_s29 }
 0x302   : > { %831 = vrot.lane.b32.xlu0 %v811_v11, %s1280_s29 }
 0x304   : > { %833 = vrot.lane.b32.xlu1 %v812_v40, %s1280_s29 }
 0x306   : > { %835 = vrot.lane.b32.xlu0 %v813_v42, %s1280_s29 }
 0x308   : > { %837 = vrot.lane.b32.xlu1 %v814_v43, %s1280_s29 }
 0x30a   : > { %871 = vrot.lane.b32.xlu0 %v855_v44, %s1283_s3 }
 0x30c   : > { %873 = vrot.lane.b32.xlu1 %v856_v45, %s1283_s3 }
 0x30e   : > { %875 = vrot.lane.b32.xlu0 %v857_v46, %s1283_s3 }
 0x310   : > { %877 = vrot.lane.b32.xlu1 %v858_v48, %s1283_s3 }
 0x312   : > { %879 = vrot.lane.b32.xlu0 %v859_v14, %s1283_s3 }
 0x314   : > { %881 = vrot.lane.b32.xlu1 %v860_v49, %s1283_s3 }
 0x316   : > { %883 = vrot.lane.b32.xlu0 %v861_v50, %s1283_s3 }
 0x318   : > { %885 = vrot.lane.b32.xlu1 %v862_v51, %s1283_s3 }
 0x31a   : > { %919 = vrot.lane.b32.xlu0 %v903_v53, %s1279_s23 }
 0x31c   : > { %921 = vrot.lane.b32.xlu1 %v904_v54, %s1279_s23 }
 0x31e   : > { %923 = vrot.lane.b32.xlu0 %v905_v55, %s1279_s23 }
 0x320   : > { %925 = vrot.lane.b32.xlu1 %v906_v56, %s1279_s23 }
 0x322   : > { %927 = vrot.lane.b32.xlu0 %v907_v18, %s1279_s23 }
 0x324   : > { %929 = vrot.lane.b32.xlu1 %v908_v34, %s1279_s23 }
 0x326   : > { %931 = vrot.lane.b32.xlu0 %v909_v8, %s1279_s23 }
 0x328   : > { %933 = vrot.lane.b32.xlu1 %v910_v32, %s1279_s23  ;;  %s1206_s23 = sshll.u32 %s1284_s20, 4  ;;  %s1207_s23 = int_to_ptr.vmem [resolvable:$false] %s1206_s23 }
 0x329   : > { %s1208_s29 = scalar_lea.vmem %s1207_s23, 2048  ;;  %p1209_p10 = scmp.lt.s32.totalorder %s1816_s6, %s1207_s23 }
 0x32a   : > { %p1210_p1 = scmp.lt.s32.totalorder %s1208_s29, %s1202_s25 }
 0x32c   : > { %p1211_p4 = por %p1210_p1, %p1209_p10 }
 0x32e   : > { %p1212_p11 = pnand %p1211_p4, %p1205_p9 }
 0x351   : > { %v776_v38 = vpop.permute.xlu0 %775 }
 0x352   : > { %v799_v16 = vadd.f32 %v776_v38, %v1634_v47 }
 0x358   : > { %v778_v57 = vpop.permute.xlu1 %777 }
 0x359   : > { %v800_v19 = vadd.f32 %v778_v57, %v1670_v41 }
 0x35c   : > { %v780_v58 = vpop.permute.xlu0 %779 }
 0x35d   : > { %v801_v27 = vadd.f32 %v780_v58, %v1706_v25 }
 0x35f   : > { %v782_v59 = vpop.permute.xlu1 %781 }
 0x360   : > { %v802_v30 = vadd.f32 %v782_v59, %v1698_v17 }
 0x361   : > { %v784_v52 = vpop.permute.xlu0 %783 }
 0x362   : > { %v803_v41 = vadd.f32 %v784_v52, %v1710_v26 }
 0x365   : > { %v786_v60 = vpop.permute.xlu1 %785 }
 0x366   : > { %v804_v17 = vadd.f32 %v786_v60, %v1715_v28 }
 0x368   : > { %v788_v61 = vpop.permute.xlu0 %787 }
 0x369   : > { %v805_v48 = vadd.f32 %v788_v61, %v1724_v35 }
 0x36a   : > { %v790_v62 = vpop.permute.xlu1 %789 }
 0x36b   : > { %v806_v28 = vadd.f32 %v790_v62, %v1721_v33 }
 0x36c   : > { %v824_v63 = vpop.permute.xlu0 %823 }
 0x36d   : > { %v847_v21 = vadd.f32 %v824_v63, %v799_v16 }
 0x36e   : > { %v826_v0 = vpop.permute.xlu1 %825 }
 0x36f   : > { %v848_v23 = vadd.f32 %v826_v0, %v800_v19 }
 0x370   : > { %v828_v1 = vpop.permute.xlu0 %827 }
 0x371   : > { %v849_v37 = vadd.f32 %v828_v1, %v801_v27 }
 0x372   : > { %v830_v2 = vpop.permute.xlu1 %829 }
 0x373   : > { %v850_v11 = vadd.f32 %v830_v2, %v802_v30 }
 0x374   : > { %v832_v3 = vpop.permute.xlu0 %831 }
 0x375   : > { %v851_v43 = vadd.f32 %v832_v3, %v803_v41 }
 0x376   : > { %v834_v4 = vpop.permute.xlu1 %833 }
 0x377   : > { %v852_v45 = vadd.f32 %v834_v4, %v804_v17 }
 0x378   : > { %v836_v5 = vpop.permute.xlu0 %835 }
 0x379   : > { %v853_v51 = vadd.f32 %v836_v5, %v805_v48 }
 0x37a   : > { %v838_v24 = vpop.permute.xlu1 %837 }
 0x37b   : > { %v854_v55 = vadd.f32 %v838_v24, %v806_v28 }
 0x37c   : > { %v872_v6 = vpop.permute.xlu0 %871 }
 0x37d   : > { %v895_v29 = vadd.f32 %v872_v6, %v847_v21 }
 0x37e   : > { %v874_v9 = vpop.permute.xlu1 %873 }
 0x37f   : > { %v896_v31 = vadd.f32 %v874_v9, %v848_v23 }
 0x380   : > { %v876_v10 = vpop.permute.xlu0 %875 }
 0x381   : > { %v897_v40 = vadd.f32 %v876_v10, %v849_v37 }
 0x382   : > { %v878_v12 = vpop.permute.xlu1 %877 }
 0x383   : > { %v898_v25 = vadd.f32 %v878_v12, %v850_v11 }
 0x384   : > { %v880_v13 = vpop.permute.xlu0 %879 }
 0x385   : > { %v899_v14 = vadd.f32 %v880_v13, %v851_v43 }
 0x386   : > { %v882_v15 = vpop.permute.xlu1 %881 }
 0x387   : > { %v900_v49 = vadd.f32 %v882_v15, %v852_v45 }
 0x388   : > { %v884_v20 = vpop.permute.xlu0 %883 }
 0x389   : > { %v901_v35 = vadd.f32 %v884_v20, %v853_v51 }
 0x38a   : > { %v886_v22 = vpop.permute.xlu1 %885 }
 0x38b   : > { %v902_v18 = vadd.f32 %v886_v22, %v854_v55 }
 0x38c   : > { %v920_v36 = vpop.permute.xlu0 %919 }
 0x38d   : > { %v943_v39 = vadd.f32 %v920_v36, %v895_v29 }
 0x38e   : > { %v922_v7 = vpop.permute.xlu1 %921 }
 0x38f   : > { %v944_v47 = vadd.f32 %v922_v7, %v896_v31  ;;  %952 = vst.msk [vmem:[%s1792_s4] sm:$0xff] %vm951_vm10, %v943_v39 }
 0x390   : > { %v924_v42 = vpop.permute.xlu0 %923 }
 0x391   : > { %953 = vst.msk [vmem:[%s1792_s4 + $0x8] sm:$0xff] %vm951_vm10, %v944_v47  ;;  %v945_v26 = vadd.f32 %v924_v42, %v897_v40 }
 0x392   : > { %v926_v44 = vpop.permute.xlu1 %925 }
 0x393   : > { %v946_v46 = vadd.f32 %v926_v44, %v898_v25  ;;  %954 = vst.msk [vmem:[%s1792_s4 + $0x10] sm:$0xff] %vm951_vm10, %v945_v26 }
 0x394   : > { %v928_v50 = vpop.permute.xlu0 %927 }
 0x395   : > { %955 = vst.msk [vmem:[%s1792_s4 + $0x18] sm:$0xff] %vm951_vm10, %v946_v46  ;;  %v947_v54 = vadd.f32 %v928_v50, %v899_v14 }
 0x396   : > { %v930_v53 = vpop.permute.xlu1 %929 }
 0x397   : > { %v948_v56 = vadd.f32 %v930_v53, %v900_v49  ;;  %956 = vst.msk [vmem:[%s1792_s4 + $0x20] sm:$0xff] %vm951_vm10, %v947_v54 }
 0x398   : > { %v932_v33 = vpop.permute.xlu0 %931 }
 0x399   : > { %957 = vst.msk [vmem:[%s1792_s4 + $0x28] sm:$0xff] %vm951_vm10, %v948_v56  ;;  %v949_v8 = vadd.f32 %v932_v33, %v901_v35 }
 0x39a   : > { %v934_v34 = vpop.permute.xlu1 %933 }
 0x39b   : > { %v950_v32 = vadd.f32 %v934_v34, %v902_v18  ;;  %958 = vst.msk [vmem:[%s1792_s4 + $0x30] sm:$0xff] %vm951_vm10, %v949_v8 }
 0x39d   : > { %959 = vst.msk [vmem:[%s1792_s4 + $0x38] sm:$0xff] %vm951_vm10, %v950_v32 }
 0x39e   : > { %1215 = shalt.err (!%p1212_p11)
}
 0x39f   : > { %s1216_s7 = scalar_lea.hbm %s1814_s24, 1024  ;;  %s1220_s26 = scalar_lea.hbm %s1866_s2, 2048 }
 0x3a0   : > { %p1217_p0 = scmp.ne.s32.totalorder %s1814_s24, %s1216_s7  ;;  %p1221_p6 = scmp.lt.u32.totalorder %s1814_s24, %s1866_s2 }
 0x3a1   : > { %p1222_p3 = scmp.lt.u32.totalorder %s1220_s26, %s1216_s7  ;;  %p1224_p5 = scmp.lt.u32.totalorder %s1216_s7, %s1814_s24 }
 0x3a2   : > { %p1218_p2 = pnand %p1217_p0, %p1880_p12 }
 0x3a3   : > { %p1223_p13 = por %p1222_p3, %p1221_p6 }
 0x3a4   : > { %p1219_p7 = pneg %p1218_p2 }
 0x3a5   : > { %p1225_p8 = por %p1224_p5, %p1223_p13 }
 0x3a7   : > { %p1226_p9 = pnand %p1225_p8, %p1219_p7 }
 0x3a9   : > { %1229 = shalt.err (!%p1226_p9)
}
 0x3aa   : > { %s1285_s28 = smov 128   ;;  %s1286_s3 = smov 8  }
 0x3ab   : > { %1096 = dma.vmem_to_hbm [thread:$0]  (%p1880_p12), %s1816_s6, 1024, %s1814_s24, %s961_s13, %s1285_s28, %s1285_s28, %s1286_s3  }
 0x3ac PF: > { %s990_s4 = sand.u32 1, %s1260_s9   ;;  %p1881_p10 = scmp.ne.s32.totalorder %s1873_s22, 0 }
 0x3ad   : > { %p1882_p1 = scmp.ge.s32.totalorder %s1272_s12, 2  ;;  %s991_s5 = scalar_lea.sflag [#allocation5], %s990_s4 }
 0x3af   : > { %p1107_p4 = pnand %p1882_p1, %p1881_p10 }
 0x3b1   : > { %1255 = dma.done.wait (!%p1107_p4), %s991_s5, 1024  }
 0x3b2   : > { %1257 = vsyncadd (!%p1107_p4), %s991_s5, 4294966272  ;;  %p16_p11 = scmp.ge.s32.totalorder %s1327_s15, 4   ;;  %s1883_s9 = smov %s1264_s10 }
 0x3b3   : > { %s1884_s10 = smov %s1268_s11  ;;  %s1885_s11 = smov %s1339_s18 }
 0x3b4   : > { %s1886_s12 = smov %s1327_s15  ;;  %18 = sbr.rel (!%p16_p11) target bundleno = 6 (0x6), region = 82 }
 0x3bb   :  { %996 = vsyncpa [#allocation4], 1 }
 0x3bc   :  { %998 = vsyncpa [#allocation4 + $0x1], 1 }
 0x3bd   :  { %999 = vsyncpa [#allocation5], 1 }
 0x3be   :  { %1001 = vsyncpa [#allocation5 + $0x1], 1 }
 0x3bf   :  { %1002 = vsyncpa [#allocation6], 1 }
 0x3c0   :  { %1004 = vsyncpa [#allocation6 + $0x1], 1 }

</bundles_post_ra>
